<compile_context>
chip_gen: v6e
topology: v6e:2x2x1
jax: 0.10.0
libtpu: 0.0.40
codegen_flags: <defaults>
</compile_context>

<pallas_src>
import jax
import jax.numpy as jnp
from jax.experimental import pallas as pl
from jax.experimental.pallas import tpu as pltpu


def _encode_pool_kernel(q_emb_ref, i_emb_ref, q_w_ref, i_w_ref,
                        w_ref, b_ref, q_rep_ref, i_rep_ref):
    """One grid step = one (query, item) sequence pair.

    q_emb_ref / i_emb_ref : [S, E]  bf16 token embeddings (batch dim squeezed)
    q_w_ref   / i_w_ref   : [1, S]  f32 pooling weights (mask/sum(mask) for 'mean',
                                    row-0 one-hot for 'cls')
    w_ref                 : [E, Hp] bf16 encoder weight (grid-invariant, VMEM-resident)
    b_ref                 : [1, Hp] f32 encoder bias    (grid-invariant, VMEM-resident)
    q_rep_ref / i_rep_ref : [1, Hp] f32 pooled sentence reps (lane-dense, Hp % 128 == 0)
    """
    w = w_ref[...]
    bias = b_ref[...]
    # Synthetic "bert_model" hot path: bf16 MXU matmul, f32 accumulate, bias + tanh in f32.
    hq = jnp.tanh(jnp.dot(q_emb_ref[...], w, preferred_element_type=jnp.float32) + bias)
    hi = jnp.tanh(jnp.dot(i_emb_ref[...], w, preferred_element_type=jnp.float32) + bias)
    # sentence_embedding: weighted reduction over the sequence axis ([1,S] @ [S,Hp]).
    # Mask + normalization (mean) or CLS selection are already folded into the weights.
    q_rep_ref[...] = jnp.dot(q_w_ref[...], hq, preferred_element_type=jnp.float32)
    i_rep_ref[...] = jnp.dot(i_w_ref[...], hi, preferred_element_type=jnp.float32)


def text_retriever_forward(q_ids, q_mask, i_ids, i_mask, params, pooling="mean"):
    emb_table, w, b = params["emb"], params["w"], params["b"]
    Bq, S = q_ids.shape
    Bi, _ = i_ids.shape
    assert Bq == Bi, "InnerProductScorer eval path assumes matching query/item batch sizes"
    B = Bq
    E = emb_table.shape[1]
    H = w.shape[1]
    Hp = ((H + 127) // 128) * 128  # lane-dense hidden dim inside the kernel

    # Glue: embedding gather stays in JAX but streams bf16 (halves the dominant HBM bytes).
    # TODO(synk): move the gather in-kernel (emb_table in pl.ANY + per-row DMA via scalar-prefetched
    #             ids) to avoid materializing the [B, S, E] activation stream in HBM at all.
    emb_bf16 = emb_table.astype(jnp.bfloat16)
    q_emb = emb_bf16[q_ids]                       # [B, S, E] bf16
    i_emb = emb_bf16[i_ids]                       # [B, S, E] bf16

    # Pad hidden dim to a multiple of 128 so every kernel store is an unmasked, lane-dense vst.
    w_p = jnp.zeros((E, Hp), jnp.bfloat16).at[:, :H].set(w.astype(jnp.bfloat16))
    b_p = jnp.zeros((1, Hp), jnp.float32).at[:, :H].set(b.reshape(1, H).astype(jnp.float32))

    # Fold attention mask + 1/sum(mask) ('mean') or the CLS selector ('cls') into per-token weights.
    if pooling == "mean":
        qm = q_mask.astype(jnp.float32)
        im = i_mask.astype(jnp.float32)
        q_w = qm / jnp.maximum(jnp.sum(qm, axis=1, keepdims=True), 1.0)
        i_w = im / jnp.maximum(jnp.sum(im, axis=1, keepdims=True), 1.0)
    else:  # 'cls'
        sel = jnp.zeros((1, S), jnp.float32).at[0, 0].set(1.0)
        q_w = jnp.broadcast_to(sel, (B, S))
        i_w = jnp.broadcast_to(sel, (B, S))
    q_w = q_w.reshape(B, 1, S)
    i_w = i_w.reshape(B, 1, S)

    cost = pl.CostEstimate(
        flops=4 * B * S * E * Hp + 4 * B * S * Hp,
        transcendentals=2 * B * S * Hp,
        bytes_accessed=(2 * B * S * E * 2) + (2 * B * S * 4)
                       + (E * Hp * 2) + (Hp * 4) + (2 * B * Hp * 4),
    )

    q_reps_p, i_reps_p = pl.pallas_call(
        _encode_pool_kernel,
        grid=(B,),
        in_specs=[
            pl.BlockSpec((None, S, E), lambda bb: (bb, 0, 0)),   # q_emb: one sequence per step
            pl.BlockSpec((None, S, E), lambda bb: (bb, 0, 0)),   # i_emb
            pl.BlockSpec((None, 1, S), lambda bb: (bb, 0, 0)),   # query pooling weights
            pl.BlockSpec((None, 1, S), lambda bb: (bb, 0, 0)),   # item pooling weights
            pl.BlockSpec((E, Hp), lambda bb: (0, 0)),            # w: resident across the grid
            pl.BlockSpec((1, Hp), lambda bb: (0, 0)),            # bias: resident across the grid
        ],
        out_specs=(
            pl.BlockSpec((None, 1, Hp), lambda bb: (bb, 0, 0)),
            pl.BlockSpec((None, 1, Hp), lambda bb: (bb, 0, 0)),
        ),
        out_shape=(
            jax.ShapeDtypeStruct((B, 1, Hp), jnp.float32),
            jax.ShapeDtypeStruct((B, 1, Hp), jnp.float32),
        ),
        compiler_params=pltpu.CompilerParams(dimension_semantics=("parallel",)),
        cost_estimate=cost,
    )(q_emb, i_emb, q_w, i_w, w_p, b_p)

    q_reps = q_reps_p[:, 0, :H]
    i_reps = i_reps_p[:, 0, :H]
    # InnerProductScorer (eval path, equal batch sizes): row-wise inner product (tiny; JAX glue).
    scores = jnp.sum(q_reps * i_reps, axis=-1)
    return {"query_reps": q_reps, "item_reps": i_reps, "scores": scores, "loss": None}


def reference_forward(q_ids, q_mask, i_ids, i_mask, params, pooling):
    # Mirrors the kernel's bf16 rounding of the embedding/weight stream; math in f32.
    emb = params["emb"].astype(jnp.bfloat16).astype(jnp.float32)
    w = params["w"].astype(jnp.bfloat16).astype(jnp.float32)
    b = params["b"].astype(jnp.float32).reshape(1, 1, -1)

    def encode(ids, mask):
        h = jnp.tanh(emb[ids] @ w + b)                   # [B, S, H]
        if pooling == "mean":
            m = mask.astype(jnp.float32)
            s = jnp.sum(h * m[..., None], axis=1)
            d = jnp.maximum(jnp.sum(m, axis=1, keepdims=True), 1.0)
            return s / d
        return h[:, 0]

    qr = encode(q_ids, q_mask)
    ir = encode(i_ids, i_mask)
    return qr, ir, jnp.sum(qr * ir, axis=-1)


if __name__ == "__main__":
    B, S, V, E, H = 2, 8, 64, 32, 32

    key = jax.random.PRNGKey(0)
    k_emb, k_w, k_b, k_qid, k_iid, k_qlen, k_ilen = jax.random.split(key, 7)

    params = {
        "emb": jax.random.normal(k_emb, (V, E), jnp.float32) * 0.1,
        "w": jax.random.normal(k_w, (E, H), jnp.float32) * 0.1,
        "b": jax.random.normal(k_b, (1, H), jnp.float32) * 0.01,
    }

    q_ids = jax.random.randint(k_qid, (B, S), 0, V)
    i_ids = jax.random.randint(k_iid, (B, S), 0, V)
    q_len = jax.random.randint(k_qlen, (B, 1), 3, S + 1)
    i_len = jax.random.randint(k_ilen, (B, 1), 3, S + 1)
    pos = jnp.arange(S)[None, :]
    q_mask = (pos < q_len).astype(jnp.int32)
    i_mask = (pos < i_len).astype(jnp.int32)

    ok = True
    for pooling in ("mean", "cls"):
        out = text_retriever_forward(q_ids, q_mask, i_ids, i_mask, params, pooling=pooling)
        jax.block_until_ready(out)
        qr_ref, ir_ref, sc_ref = reference_forward(q_ids, q_mask, i_ids, i_mask, params, pooling)
        ok &= bool(jnp.allclose(out["query_reps"], qr_ref, atol=1e-4, rtol=1e-4))
        ok &= bool(jnp.allclose(out["item_reps"], ir_ref, atol=1e-4, rtol=1e-4))
        ok &= bool(jnp.allclose(out["scores"], sc_ref, atol=1e-4, rtol=1e-4))

    if ok:
        print("KERNEL_OK")
    else:
        print("KERNEL_MISMATCH")
</pallas_src>

<mosaic_0001>
module attributes {stable_mosaic.version = 11 : i64} {
  func.func @_encode_pool_kernel(%arg0: i32, %arg1: memref<1x8x32xbf16, #tpu.memory_space<vmem>>, %arg2: memref<1x8x32xbf16, #tpu.memory_space<vmem>>, %arg3: memref<1x1x8xf32, #tpu.memory_space<vmem>>, %arg4: memref<1x1x8xf32, #tpu.memory_space<vmem>>, %arg5: memref<32x128xbf16, #tpu.memory_space<vmem>>, %arg6: memref<1x128xf32, #tpu.memory_space<vmem>>, %arg7: memref<1x1x128xf32, #tpu.memory_space<vmem>>, %arg8: memref<1x1x128xf32, #tpu.memory_space<vmem>>) attributes {dimension_semantics = [#tpu.dimension_semantics<parallel>], iteration_bounds = array<i64: 2>, scalar_prefetch = 0 : i64, scratch_operands = 0 : i64, tpu.core_type = #tpu.core_type<tc>, window_params = [{transform_indices = @transform_0, window_bounds = array<i64: 1, 8, 32>}, {transform_indices = @transform_1, window_bounds = array<i64: 1, 8, 32>}, {transform_indices = @transform_2, window_bounds = array<i64: 1, 1, 8>}, {transform_indices = @transform_3, window_bounds = array<i64: 1, 1, 8>}, {pipeline_mode = #tpu.pipeline_mode<synchronous>, transform_indices = @transform_4, window_bounds = array<i64: 32, 128>}, {pipeline_mode = #tpu.pipeline_mode<synchronous>, transform_indices = @transform_5, window_bounds = array<i64: 1, 128>}, {transform_indices = @transform_6, window_bounds = array<i64: 1, 1, 128>}, {transform_indices = @transform_7, window_bounds = array<i64: 1, 1, 128>}]} {
    %c0 = arith.constant 0 : index
    %c0_0 = arith.constant 0 : index
    %0 = vector.load %arg5[%c0, %c0_0] : memref<32x128xbf16, #tpu.memory_space<vmem>>, vector<32x128xbf16>
    %c0_1 = arith.constant 0 : index
    %c0_2 = arith.constant 0 : index
    %1 = vector.load %arg6[%c0_1, %c0_2] : memref<1x128xf32, #tpu.memory_space<vmem>>, vector<1x128xf32>
    %c0_3 = arith.constant 0 : index
    %c0_4 = arith.constant 0 : index
    %c0_5 = arith.constant 0 : index
    %2 = vector.load %arg1[%c0_3, %c0_4, %c0_5] : memref<1x8x32xbf16, #tpu.memory_space<vmem>>, vector<1x8x32xbf16>
    %3 = vector.shape_cast %2 : vector<1x8x32xbf16> to vector<8x32xbf16>
    %cst = arith.constant dense<0.000000e+00> : vector<8x128xf32>
    %4 = tpu.matmul %3, %0, %cst {dimension_numbers = #tpu.dot_dimension_numbers<[1], [0], [0], [1], [0, 0, 1, 1], [], []>} : vector<8x32xbf16>, vector<32x128xbf16>, vector<8x128xf32> -> vector<8x128xf32>
    %5 = vector.broadcast %1 : vector<1x128xf32> to vector<8x128xf32>
    %6 = arith.addf %4, %5 : vector<8x128xf32>
    %7 = math.tanh %6 : vector<8x128xf32>
    %c0_6 = arith.constant 0 : index
    %c0_7 = arith.constant 0 : index
    %c0_8 = arith.constant 0 : index
    %8 = vector.load %arg2[%c0_6, %c0_7, %c0_8] : memref<1x8x32xbf16, #tpu.memory_space<vmem>>, vector<1x8x32xbf16>
    %9 = vector.shape_cast %8 : vector<1x8x32xbf16> to vector<8x32xbf16>
    %cst_9 = arith.constant dense<0.000000e+00> : vector<8x128xf32>
    %10 = tpu.matmul %9, %0, %cst_9 {dimension_numbers = #tpu.dot_dimension_numbers<[1], [0], [0], [1], [0, 0, 1, 1], [], []>} : vector<8x32xbf16>, vector<32x128xbf16>, vector<8x128xf32> -> vector<8x128xf32>
    %11 = vector.broadcast %1 : vector<1x128xf32> to vector<8x128xf32>
    %12 = arith.addf %10, %11 : vector<8x128xf32>
    %13 = math.tanh %12 : vector<8x128xf32>
    %c0_10 = arith.constant 0 : index
    %c0_11 = arith.constant 0 : index
    %c0_12 = arith.constant 0 : index
    %14 = vector.load %arg3[%c0_10, %c0_11, %c0_12] : memref<1x1x8xf32, #tpu.memory_space<vmem>>, vector<1x1x8xf32>
    %15 = vector.shape_cast %14 : vector<1x1x8xf32> to vector<1x8xf32>
    %cst_13 = arith.constant dense<0.000000e+00> : vector<1x128xf32>
    %16 = tpu.matmul %15, %7, %cst_13 {dimension_numbers = #tpu.dot_dimension_numbers<[1], [0], [0], [1], [0, 0, 1, 1], [], []>} : vector<1x8xf32>, vector<8x128xf32>, vector<1x128xf32> -> vector<1x128xf32>
    %c0_14 = arith.constant 0 : index
    %c0_15 = arith.constant 0 : index
    %c0_16 = arith.constant 0 : index
    %17 = vector.load %arg7[%c0_14, %c0_15, %c0_16] : memref<1x1x128xf32, #tpu.memory_space<vmem>>, vector<1x1x128xf32>
    %18 = vector.shape_cast %17 : vector<1x1x128xf32> to vector<1x128xf32>
    %19 = vector.shape_cast %16 : vector<1x128xf32> to vector<1x1x128xf32>
    tpu.vector_store %arg7[%c0_14, %c0_15, %c0_16], %19 {strides = array<i32>} : memref<1x1x128xf32, #tpu.memory_space<vmem>>, vector<1x1x128xf32>,
    %c0_17 = arith.constant 0 : index
    %c0_18 = arith.constant 0 : index
    %c0_19 = arith.constant 0 : index
    %20 = vector.load %arg4[%c0_17, %c0_18, %c0_19] : memref<1x1x8xf32, #tpu.memory_space<vmem>>, vector<1x1x8xf32>
    %21 = vector.shape_cast %20 : vector<1x1x8xf32> to vector<1x8xf32>
    %cst_20 = arith.constant dense<0.000000e+00> : vector<1x128xf32>
    %22 = tpu.matmul %21, %13, %cst_20 {dimension_numbers = #tpu.dot_dimension_numbers<[1], [0], [0], [1], [0, 0, 1, 1], [], []>} : vector<1x8xf32>, vector<8x128xf32>, vector<1x128xf32> -> vector<1x128xf32>
    %c0_21 = arith.constant 0 : index
    %c0_22 = arith.constant 0 : index
    %c0_23 = arith.constant 0 : index
    %23 = vector.load %arg8[%c0_21, %c0_22, %c0_23] : memref<1x1x128xf32, #tpu.memory_space<vmem>>, vector<1x1x128xf32>
    %24 = vector.shape_cast %23 : vector<1x1x128xf32> to vector<1x128xf32>
    %25 = vector.shape_cast %22 : vector<1x128xf32> to vector<1x1x128xf32>
    tpu.vector_store %arg8[%c0_21, %c0_22, %c0_23], %25 {strides = array<i32>} : memref<1x1x128xf32, #tpu.memory_space<vmem>>, vector<1x1x128xf32>,
    return
  }
  func.func @transform_0(%arg0: i32) -> (i32, i32, i32) {
    %c0_i32 = arith.constant 0 : i32
    %c0_i32_0 = arith.constant 0 : i32
    %c0_i32_1 = arith.constant 0 : i32
    return %arg0, %c0_i32, %c0_i32_0 : i32, i32, i32
  }
  func.func @transform_1(%arg0: i32) -> (i32, i32, i32) {
    %c0_i32 = arith.constant 0 : i32
    %c0_i32_0 = arith.constant 0 : i32
    %c0_i32_1 = arith.constant 0 : i32
    return %arg0, %c0_i32, %c0_i32_0 : i32, i32, i32
  }
  func.func @transform_2(%arg0: i32) -> (i32, i32, i32) {
    %c0_i32 = arith.constant 0 : i32
    %c0_i32_0 = arith.constant 0 : i32
    %c0_i32_1 = arith.constant 0 : i32
    return %arg0, %c0_i32, %c0_i32_0 : i32, i32, i32
  }
  func.func @transform_3(%arg0: i32) -> (i32, i32, i32) {
    %c0_i32 = arith.constant 0 : i32
    %c0_i32_0 = arith.constant 0 : i32
    %c0_i32_1 = arith.constant 0 : i32
    return %arg0, %c0_i32, %c0_i32_0 : i32, i32, i32
  }
  func.func @transform_4(%arg0: i32) -> (i32, i32) {
    %c0_i32 = arith.constant 0 : i32
    %c0_i32_0 = arith.constant 0 : i32
    %c0_i32_1 = arith.constant 0 : i32
    return %c0_i32, %c0_i32_0 : i32, i32
  }
  func.func @transform_5(%arg0: i32) -> (i32, i32) {
    %c0_i32 = arith.constant 0 : i32
    %c0_i32_0 = arith.constant 0 : i32
    %c0_i32_1 = arith.constant 0 : i32
    return %c0_i32, %c0_i32_0 : i32, i32
  }
  func.func @transform_6(%arg0: i32) -> (i32, i32, i32) {
    %c0_i32 = arith.constant 0 : i32
    %c0_i32_0 = arith.constant 0 : i32
    %c0_i32_1 = arith.constant 0 : i32
    return %arg0, %c0_i32, %c0_i32_0 : i32, i32, i32
  }
  func.func @transform_7(%arg0: i32) -> (i32, i32, i32) {
    %c0_i32 = arith.constant 0 : i32
    %c0_i32_0 = arith.constant 0 : i32
    %c0_i32_1 = arith.constant 0 : i32
    return %arg0, %c0_i32, %c0_i32_0 : i32, i32, i32
  }
}

</mosaic_0001>

<bundles_post_ra>
// kernel: tpu_custom_call.1
= control target key start
LH: loop header
LB: loop body
LE: loop exit
PB: predicated region body
PF: predicated region fallthrough
CT: control target
= control target key end

     0   :  { %s1443_s0 = inlined_call_operand.hbm [shape: bf16[2,8,32], index: 0, kind: input, shape index: {}]   ;;  %s1444_s1 = inlined_call_operand.hbm [shape: bf16[2,8,32], index: 1, kind: input, shape index: {}]   ;;  %s1445_s2 = inlined_call_operand.vmem [shape: f32[2,1,8], index: 2, kind: input, shape index: {}]   ;;  %s1446_s3 = inlined_call_operand.vmem [shape: f32[2,1,8], index: 3, kind: input, shape index: {}]   ;;  %s1447_s4 = inlined_call_operand.hbm [shape: bf16[32,128], index: 4, kind: input, shape index: {}]   ;;  %s1448_s5 = inlined_call_operand.vmem [shape: f32[1,128], index: 5, kind: input, shape index: {}]   ;;  %s1449_s6 = inlined_call_operand.hbm [shape: f32[2,1,128], index: 6, kind: output, shape index: {0}]   ;;  %s1450_s7 = inlined_call_operand.hbm [shape: f32[2,1,128], index: 7, kind: output, shape index: {1}]  }
   0x1   :  { %1458 = sst [smem:[#allocation19_spill]] %s1447_s4 }
   0x2   :  { %13 = vsyncpa [#allocation3], 0 }
   0x3   :  { %15 = vsyncpa [#allocation3 + $0x1], 0 }
   0x4   :  { %16 = vsyncpa [#allocation6], 0 }
   0x5   :  { %18 = vsyncpa [#allocation6 + $0x1], 0 }
   0x6   :  { %19 = vsyncpa [#allocation4], 0 }
   0x7   :  { %21 = vsyncpa [#allocation4 + $0x1], 0 }
   0x8   :  { %22 = vsyncpa [#allocation10], 0 }
   0x9   :  { %24 = vsyncpa [#allocation10 + $0x1], 0  ;;  %s1193_s24 = smov 0   ;;  %s1195_s25 = smov 0  }
   0xa   :  { %s1197_s26 = smov 0   ;;  %s1199_s27 = smov 0  }
   0xb LB: > { %1459 = sst [smem:[#allocation16_spill]] %s1138_s26  ;;  %s1214_s28 = sadd.s32 4294967295, %s1142_s27   ;;  %s1142_s27 = sphi %s1199_s27, %s1477_s27   ;;  %s1138_s26 = sphi %s1197_s26, %s1479_s26   ;;  %s1134_s25 = sphi %s1195_s25, %s1481_s25   ;;  %s1130_s24 = sphi %s1193_s24, %s1480_s24  }
   0xc   : > { %s822_s29 = sadd.s32 4294967294, %s1142_s27   ;;  %p50_p0 = scmp.ne.s32.totalorder %s1134_s25, %s1130_s24 }
   0xd   : > { %p1454_p1 = scmp.eq.s32.totalorder %s1214_s28, 0  ;;  %p200_p3 = scmp.eq.s32.totalorder %s822_s29, 1 }
   0xe   : > { %p823_p5 = scmp.ge.s32.totalorder %s1142_s27, 1  ;;  %p233_p7 = scmp.lt.s32.totalorder %s1142_s27, 3 }
   0xf   : > { %p1223_p4 = por %p1454_p1, %p50_p0  ;;  %p1228_p6 = por %p200_p3, %p50_p0 }
  0x10   : > { %p1233_p8 = pnand %p823_p5, %p233_p7  ;;  %s1144_s10 = smov [#allocation7]  }
  0x11   : > { %s1460_s30 = scalar_select %p1223_p4, 1, 0 }
  0x12   : > { %s1461_s8 = scalar_select %p1228_p6, 1, 0 }
  0x13   : > { %s1462_s9 = scalar_select %p1233_p8, 1, 0 }
  0x14   : > { %s245_s11 = sshll.u32 %s1144_s10, 4  ;;  %p893_p9 = pneg %p1233_p8  ;;  %s246_s11 = int_to_ptr.vmem [resolvable:$true] %s245_s11 }
  0x15   : > { %s1247_s13 = sadd.s32 1, %s1142_s27   ;;  %s37_s14 = sadd.s32 1, %s1138_s26 }
  0x16   : > { %p1242_p11 = pnand %p893_p9, %p1454_p1  ;;  %1464 = sst [smem:[#allocation17_spill]] %s1247_s13 }
  0x17   : > { %s34_s15 = ssub.s32 %s1142_s27, %s1247_s13  ;;  %s969_s16 = scalar_lea.vmem %s246_s11, 256 }
  0x18   : > { %p960_p12 = pneg %p1242_p11  ;;  %p970_p13 = scmp.ne.s32.totalorder %s246_s11, %s969_s16 }
  0x19   : > { %p977_p5 = scmp.lt.s32.totalorder %s246_s11, %s246_s11  ;;  %p978_p7 = scmp.lt.s32.totalorder %s969_s16, %s969_s16 }
  0x1a   : > { %p972_p0 = pnand %p970_p13, %p960_p12 }
  0x1b   : > { %p979_p10 = por %p978_p7, %p977_p5 }
  0x1c   : > { %p973_p3 = pneg %p972_p0 }
  0x1e   : > { %p980_p2 = pnand %p979_p10, %p973_p3 }
  0x20   : > { %983 = shalt.err (!%p980_p2)
}
  0x21   : > { %s1145_s17 = smov 64   ;;  %s1146_s18 = smov 4  }
  0x22   : > { %s1465_s4 = sld [smem:[#allocation19_spill]]  ;;  %p35_p9 = scmp.eq.s32.totalorder %s34_s15, 0 }
  0x23   : > { %p44_p12 = scmp.ne.s32.totalorder %s1138_s26, %s1134_s25  ;;  %p45_p10 = scmp.eq.s32.totalorder %s1142_s27, 0 }
  0x24   : > { %p912_p2 = scmp.lt.s32.totalorder %s1142_s27, 2  ;;  %p1467_p0 = scmp.eq.s32.totalorder %s1214_s28, 1 }
  0x25   : > { %s1264_s21 = scalar_select %p35_p9, %s1138_s26, %s37_s14  }
  0x26   : > { %p46_p13 = por %p45_p10, %p44_p12  ;;  %p1268_p3 = por %p1467_p0, %p44_p12 }
  0x27   : > { %1466 = sst [smem:[#allocation18_spill]] %s1264_s21  ;;  %s262_s23 = sand.u32 1, %s1138_s26  }
  0x28   : > { %896 = dma.hbm_to_vmem [thread:$0]  (!%p1242_p11), %s1465_s4, 256, %s246_s11, [#allocation6], %s1145_s17, %s1145_s17, %s1146_s18  }
  0x29   : > { %s1468_s22 = scalar_select %p1268_p3, 1, 0 }
  0x2a   : > { %s827_s29 = sshll.u32 %s1142_s27, 6  ;;  %s1274_s10 = sshll.u32 %s262_s23, 2 }
  0x2b   : > { %s1279_s11 = scalar_lea.hbm %s1443_s0, %s827_s29  ;;  %s266_s14 = scalar_lea.vmem [#allocation2], %s1274_s10 }
  0x2c   : > { %s273_s15 = sshll.u32 %s266_s14, 4  ;;  %p1282_p11 = pnand %p912_p2, %p46_p13  ;;  %s274_s15 = int_to_ptr.vmem [resolvable:$true] %s273_s15 }
  0x2d   : > { %s1289_s20 = scalar_lea.hbm %s1444_s1, %s827_s29  ;;  %s263_s12 = scalar_lea.sflag [#allocation3], %s262_s23 }
  0x2e   : > { %s984_s16 = scalar_lea.hbm %s1279_s11, 64  ;;  %p986_p7 = pneg %p1282_p11 }
  0x2f   : > { %p985_p5 = scmp.ne.s32.totalorder %s1279_s11, %s984_s16  ;;  %s989_s21 = scalar_lea.hbm %s1443_s0, 128 }
  0x30   : > { %p990_p10 = scmp.lt.s32.totalorder %s1279_s11, %s1443_s0  ;;  %p991_p2 = scmp.lt.s32.totalorder %s989_s21, %s984_s16 }
  0x31   : > { %p987_p9 = pnand %p986_p7, %p985_p5 }
  0x32   : > { %p992_p13 = por %p991_p2, %p990_p10 }
  0x33   : > { %p988_p12 = pneg %p987_p9 }
  0x35   : > { %p993_p0 = pnand %p992_p13, %p988_p12 }
  0x37   : > { %996 = shalt.err (!%p993_p0)
}
  0x38   : > { %s997_s23 = scalar_lea.vmem %s274_s15, 64  ;;  %s1147_s29 = smov [#allocation2]  }
  0x39   : > { %p998_p1 = scmp.ne.s32.totalorder %s274_s15, %s997_s23  ;;  %s1002_s18 = sshll.u32 %s1147_s29, 4  ;;  %s1003_s18 = int_to_ptr.vmem [resolvable:$false] %s1002_s18 }
  0x3a   : > { %s1004_s4 = scalar_lea.vmem %s1003_s18, 128  ;;  %p1005_p9 = scmp.lt.s32.totalorder %s274_s15, %s1003_s18 }
  0x3b   : > { %p1000_p6 = pnand %p998_p1, %p986_p7  ;;  %p1006_p3 = scmp.lt.s32.totalorder %s1004_s4, %s997_s23 }
  0x3d   : > { %p1001_p5 = pneg %p1000_p6  ;;  %p1007_p4 = por %p1006_p3, %p1005_p9 }
  0x3f   : > { %p1008_p8 = pnand %p1007_p4, %p1001_p5 }
  0x41   : > { %1011 = shalt.err (!%p1008_p8)
}
  0x42   : > { %900 = dma.hbm_to_vmem [thread:$0]  (!%p1282_p11), %s1279_s11, 64, %s274_s15, %s263_s12  }
  0x43   : > { %s280_s26 = sand.u32 1, %s1142_s27   ;;  %s284_s13 = scalar_lea.vmem [#allocation5], %s1274_s10 }
  0x44   : > { %s291_s21 = sshll.u32 %s284_s13, 4  ;;  %s281_s19 = scalar_lea.sflag [#allocation6], %s280_s26  ;;  %s292_s21 = int_to_ptr.vmem [resolvable:$true] %s291_s21 }
  0x45   : > { %s1012_s16 = scalar_lea.hbm %s1289_s20, 64  ;;  %s1017_s29 = scalar_lea.hbm %s1444_s1, 128 }
  0x46   : > { %p1013_p1 = scmp.ne.s32.totalorder %s1289_s20, %s1012_s16  ;;  %p1018_p8 = scmp.lt.s32.totalorder %s1289_s20, %s1444_s1 }
  0x47   : > { %p1019_p3 = scmp.lt.s32.totalorder %s1017_s29, %s1012_s16 }
  0x48   : > { %p1015_p4 = pnand %p1013_p1, %p986_p7 }
  0x49   : > { %p1020_p12 = por %p1019_p3, %p1018_p8 }
  0x4a   : > { %p1016_p6 = pneg %p1015_p4 }
  0x4c   : > { %p1021_p10 = pnand %p1020_p12, %p1016_p6 }
  0x4e   : > { %1024 = shalt.err (!%p1021_p10)
}
  0x4f   : > { %s1025_s10 = scalar_lea.vmem %s292_s21, 64  ;;  %s1148_s11 = smov [#allocation5]  }
  0x50   : > { %p1026_p2 = scmp.ne.s32.totalorder %s292_s21, %s1025_s10  ;;  %s1030_s15 = sshll.u32 %s1148_s11, 4  ;;  %s1031_s15 = int_to_ptr.vmem [resolvable:$false] %s1030_s15 }
  0x51   : > { %s1032_s12 = scalar_lea.vmem %s1031_s15, 128  ;;  %p1033_p5 = scmp.lt.s32.totalorder %s292_s21, %s1031_s15 }
  0x52   : > { %p1028_p13 = pnand %p1026_p2, %p986_p7  ;;  %p1034_p9 = scmp.lt.s32.totalorder %s1032_s12, %s1025_s10 }
  0x54   : > { %p1029_p0 = pneg %p1028_p13  ;;  %p1035_p1 = por %p1034_p9, %p1033_p5 }
  0x56   : > { %p1036_p4 = pnand %p1035_p1, %p1029_p0 }
  0x58   : > { %1039 = shalt.err (!%p1036_p4)
}
  0x59   : > { %903 = dma.hbm_to_vmem [thread:$0]  (!%p1282_p11), %s1289_s20, 64, %s292_s21, %s281_s19  }
  0x5a   : > { %p1470_p6 = scmp.ne.s32.totalorder %s1462_s9, 0 }
  0x5b   : > { %s1334_s26 = sand.u32 (!%p1470_p6), 1, %s1134_s25   ;;  %p1471_p7 = scmp.ne.s32.totalorder (!%p1470_p6), %s1460_s30, 0 }
  0x5c   : > { %312 = sbr.rel (%p1470_p6) target bundleno = 553 (0x229), region = 44  ;;  %s831_s13 = sshll.u32 (!%p1470_p6), %s1334_s26, 2 }
  0x5d   : > { %s315_s16 = scalar_lea.sflag (!%p1470_p6), [#allocation3], %s1334_s26  ;;  %s318_s14 = scalar_lea.vmem (!%p1470_p6), [#allocation2], %s831_s13 }
  0x61   : > { %1109 = dma.done.wait (%p1471_p7), %s315_s16, 64  }
  0x62   : > { %1111 = vsyncadd (%p1471_p7), %s315_s16, 4294967232  ;;  %s323_s17 = sand.u32 1, %s1214_s28   ;;  %s327_s9 = scalar_lea.vmem [#allocation5], %s831_s13 }
  0x63   : > { %s324_s20 = scalar_lea.sflag [#allocation6], %s323_s17 }
  0x64   : > { %1113 = dma.done.wait (%p1471_p7), %s324_s20, 64  }
  0x65   : > { %1115 = vsyncadd (%p1471_p7), %s324_s20, 4294967232  ;;  %p1472_p11 = scmp.eq.s32.totalorder %s1214_s28, 0 }
  0x67   : > { %1117 = dma.done.wait (%p1472_p11), [#allocation6], 256   ;;  %p1473_p8 = pmov %p1472_p11 }
  0x68   : > { %v1149_v0 = vmov 0.0   ;;  %vm1150_vm0 = vmmov 0   ;;  %v952_v1 = vld [vmem:[#allocation7 + $0x8] sm:$0xff]   ;;  %v953_v2 = vld [vmem:[#allocation7] sm:$0xff]   ;;  %v388_v3 = vld [vmem:[%s318_s14] sm:$0xf] }
  0x69   : > { %1119 = vsyncadd (%p1473_p8), [#allocation6], 4294967040  ;;  %855 = vmatprep.subr.bf16.mxu0 %v1149_v0  ;;  %863 = vmatprep.subr.bf16.mxu1 %v1149_v0  ;;  %vm407_vm1 = vcmask 261120   ;;  %v452_v4 = vld [vmem:[%s327_s9] sm:$0xf]  ;;  %p376_p3 = scmp.lt.s32.totalorder %s1214_s28, 1 }
  0x6a   : > { %859 = vmatprep.mubr.msk.bf16.mxu0 %vm1150_vm0, %v1149_v0  ;;  %867 = vmatprep.mubr.msk.bf16.mxu1 %vm1150_vm0, %v1149_v0  ;;  %v834_v5 = vld [vmem:[%s1448_s5] ss:$0 sm:$0xff]  ;;  %vm498_vm2 = vcmask 64512   ;;  %s369_s15 = scalar_lea.vmem [#allocation8], %s1334_s26  ;;  %s375_s13 = scalar_lea.vmem [#allocation9], %s1334_s26 }
  0x6b   : > { %856 = vmatpush3.bf16.msra.mxu0 %v952_v1  ;;  %864 = vmatpush3.bf16.msra.mxu1 %v952_v1  ;;  %s377_s19 = scalar_select %p376_p3, %s1214_s28, 1 }
  0x6c   : > { %857 = vmatprep.subr.bf16.mxu0 %v1149_v0  ;;  %865 = vmatprep.subr.bf16.mxu1 %v1149_v0  ;;  %s665_s12 = sshll.u32 %s369_s15, 4  ;;  %s678_s16 = sshll.u32 %s375_s13, 4  ;;  %s1369_s12 = int_to_ptr.vmem [resolvable:$true] %s665_s12  ;;  %s1371_s16 = int_to_ptr.vmem [resolvable:$true] %s678_s16 }
  0x6d   : > { %s378_s18 = scalar_lea.vmem %s1445_s2, %s377_s19  ;;  %s381_s11 = scalar_lea.vmem %s1446_s3, %s377_s19 }
  0x6e   : > { %v497_v16 = vld [vmem:[%s378_s18] sm:$0x1]  ;;  %s841_s14 = sshll.u32 %s1214_s28, 4  ;;  %s649_s28 = scalar_lea.sflag [#allocation4], %s1334_s26 }
  0x6f   : > { %858 = vmatpush3.bf16.msra.mxu0 %v953_v2  ;;  %866 = vmatpush3.bf16.msra.mxu1 %v953_v2  ;;  %v573_v18 = vld [vmem:[%s381_s11] sm:$0x1]  ;;  %s1376_s9 = scalar_lea.hbm %s1449_s6, %s841_s14  ;;  %s1381_s19 = scalar_lea.hbm %s1450_s7, %s841_s14 }
  0x70   : > { %871 = vmatprep.subr.mxu0 %v1149_v0  ;;  %876 = vmatprep.subr.mxu1 %v1149_v0  ;;  %s1040_s23 = scalar_lea.vmem %s1369_s12, 16  ;;  %p1474_p10 = scmp.ne.s32.totalorder %s1468_s22, 0 }
  0x71   : > { %p1041_p12 = scmp.ne.s32.totalorder %s1369_s12, %s1040_s23  ;;  %s1151_s29 = smov [#allocation8]  }
  0x72   : > { %860 = vmatmul.mubr.msk.bf16.vlgmr.msra.gmra.mxu0 %vm407_vm1, %v388_v3  ;;  %868 = vmatmul.mubr.msk.bf16.vlgmr.msra.gmra.mxu1 %vm407_vm1, %v452_v4  ;;  %s1044_s18 = sshll.u32 %s1151_s29, 4  ;;  %s1045_s18 = int_to_ptr.vmem [resolvable:$false] %s1044_s18 }
  0x73   : > { %873 = vmatprep.mubr.msk.f32.mxu0 %vm1150_vm0, %v1149_v0  ;;  %878 = vmatprep.mubr.msk.f32.mxu1 %vm1150_vm0, %v1149_v0  ;;  %p1042_p2 = pnand %p1041_p12, %p1474_p10  ;;  %s1046_s4 = scalar_lea.vmem %s1045_s18, 32 }
  0x74   : > { %p1047_p0 = scmp.lt.s32.totalorder %s1369_s12, %s1045_s18  ;;  %p1048_p5 = scmp.lt.s32.totalorder %s1046_s4, %s1040_s23 }
  0x75   : > { %p1043_p13 = pneg %p1042_p2 }
  0x76   : > { %p1049_p9 = por %p1048_p5, %p1047_p0 }
  0x78   : > { %p1050_p1 = pnand %p1049_p9, %p1043_p13 }
 0x132   : > { %v445_v6 = vpop.f32.mrf.mxu0  ;;  %v490_v7 = vpop.f32.mrf.mxu1 }
 0x133   : > { %v446_v8 = vadd.f32 %v834_v5, %v445_v6  ;;  %v491_v9 = vadd.f32 %v834_v5, %v490_v7 }
 0x134   : > { %v861_v10 = vpop.f32.mrf.mxu0  ;;  %v869_v11 = vpop.f32.mrf.mxu1 }
 0x135   : > { %954 = vtanh.f32 %v446_v8 }
 0x136   : > { %956 = vtanh.f32 %v491_v9  ;;  %v448_v12 = vpop.f32.mrf.mxu0  ;;  %v493_v13 = vpop.f32.mrf.mxu1 }
 0x138   : > { %v862_v14 = vpop.f32.mrf.mxu0  ;;  %v870_v15 = vpop.f32.mrf.mxu1 }
 0x142   : > { %v955_v17 = vpop.eup %954 }
 0x143   : > { %v957_v19 = vpop.eup %956  ;;  %872 = vmatpush3.msra.mxu0 %v955_v17 }
 0x144   : > { %877 = vmatpush3.msra.mxu1 %v957_v19  ;;  %874 = vmatmul.mubr.msk.f32.vlgmr.msra.gmra.mxu0 %vm498_vm2, %v497_v16 }
 0x145   : > { %879 = vmatmul.mubr.msk.f32.vlgmr.msra.gmra.mxu1 %vm498_vm2, %v573_v18 }
 0x204   : > { %v568_v20 = vpop.f32.mrf.mxu0 }
 0x205   : > { %572 = vst [vmem:[%s369_s15] sm:$0x1] %v568_v20  ;;  %v643_v21 = vpop.f32.mrf.mxu1 }
 0x206   : > { %647 = vst [vmem:[%s375_s13] sm:$0x1] %v643_v21  ;;  %v875_v22 = vpop.f32.mrf.mxu0 }
 0x207   : > { %1053 = shalt.err (!%p1050_p1)
}
 0x208   : > { %s1054_s10 = scalar_lea.hbm %s1376_s9, 16  ;;  %s1058_s13 = scalar_lea.hbm %s1449_s6, 32 }
 0x209   : > { %p1055_p4 = scmp.ne.s32.totalorder %s1376_s9, %s1054_s10  ;;  %p1059_p11 = scmp.lt.s32.totalorder %s1376_s9, %s1449_s6 }
 0x20a   : > { %p1060_p8 = scmp.lt.s32.totalorder %s1058_s13, %s1054_s10 }
 0x20b   : > { %p1056_p6 = pnand %p1055_p4, %p1474_p10 }
 0x20c   : > { %p1061_p3 = por %p1060_p8, %p1059_p11 }
 0x20d   : > { %p1057_p7 = pneg %p1056_p6 }
 0x20f   : > { %p1062_p12 = pnand %p1061_p3, %p1057_p7 }
 0x211   : > { %1065 = shalt.err (!%p1062_p12)
}
 0x212   : > { %889 = dma.vmem_to_hbm [thread:$0]  (%p1474_p10), %s1369_s12, 16, %s1376_s9, %s649_s28   ;;  %v880_v23 = vpop.f32.mrf.mxu1 }
 0x213   : > { %s653_s20 = scalar_lea.sflag [#allocation10], %s1334_s26  ;;  %s1066_s30 = scalar_lea.vmem %s1371_s16, 16 }
 0x214   : > { %p1067_p2 = scmp.ne.s32.totalorder %s1371_s16, %s1066_s30  ;;  %s1152_s21 = smov [#allocation9]  }
 0x215   : > { %s1070_s23 = sshll.u32 %s1152_s21, 4  ;;  %s1071_s23 = int_to_ptr.vmem [resolvable:$false] %s1070_s23 }
 0x216   : > { %p1068_p13 = pnand %p1067_p2, %p1474_p10  ;;  %s1072_s29 = scalar_lea.vmem %s1071_s23, 32 }
 0x217   : > { %p1073_p5 = scmp.lt.s32.totalorder %s1371_s16, %s1071_s23  ;;  %p1074_p9 = scmp.lt.s32.totalorder %s1072_s29, %s1066_s30 }
 0x218   : > { %p1069_p0 = pneg %p1068_p13 }
 0x219   : > { %p1075_p1 = por %p1074_p9, %p1073_p5 }
 0x21b   : > { %p1076_p4 = pnand %p1075_p1, %p1069_p0 }
 0x21d   : > { %1079 = shalt.err (!%p1076_p4)
}
 0x21e   : > { %s1080_s12 = scalar_lea.hbm %s1381_s19, 16  ;;  %s1084_s28 = scalar_lea.hbm %s1450_s7, 32 }
 0x21f   : > { %p1081_p6 = scmp.ne.s32.totalorder %s1381_s19, %s1080_s12  ;;  %p1085_p8 = scmp.lt.s32.totalorder %s1381_s19, %s1450_s7 }
 0x220   : > { %p1086_p3 = scmp.lt.s32.totalorder %s1084_s28, %s1080_s12 }
 0x221   : > { %p1082_p7 = pnand %p1081_p6, %p1474_p10 }
 0x222   : > { %p1087_p12 = por %p1086_p3, %p1085_p8 }
 0x223   : > { %p1083_p11 = pneg %p1082_p7 }
 0x225   : > { %p1088_p2 = pnand %p1087_p12, %p1083_p11 }
 0x227   : > { %1091 = shalt.err (!%p1088_p2)
}
 0x228   : > { %890 = dma.vmem_to_hbm [thread:$0]  (%p1474_p10), %s1371_s16, 16, %s1381_s19, %s653_s20  }
 0x229 PF: > { %s690_s10 = sand.u32 1, %s1130_s24   ;;  %p1475_p13 = scmp.ne.s32.totalorder %s1461_s8, 0 }
 0x22a   : > { %p1476_p0 = scmp.ge.s32.totalorder %s1142_s27, 2  ;;  %s691_s11 = scalar_lea.sflag [#allocation4], %s690_s10 }
 0x22c   : > { %p905_p5 = pnand %p1476_p0, %p1475_p13 }
 0x22e   : > { %p906_p9 = pneg %p905_p5 }
 0x230   : > { %1121 = dma.done.wait (%p906_p9), %s691_s11, 16  }
 0x231   : > { %1123 = vsyncadd (%p906_p9), %s691_s11, 4294967280  ;;  %s699_s15 = scalar_lea.sflag [#allocation10], %s690_s10 }
 0x232   : > { %1125 = dma.done.wait (%p906_p9), %s699_s15, 16  }
 0x233   : > { %1127 = vsyncadd (%p906_p9), %s699_s15, 4294967280  ;;  %s1477_s27 = sld [smem:[#allocation17_spill]]  ;;  %s1480_s24 = smov %s1134_s25 }
 0x234   : > { %s1478_s22 = sld [smem:[#allocation16_spill]] }
 0x235   : > { %s1479_s26 = sld [smem:[#allocation18_spill]] }
 0x239   : > { %p27_p10 = scmp.ge.s32.totalorder %s1477_s27, 4  }
 0x23a   : > { %s1481_s25 = smov %s1478_s22 }
 0x23b   :  { %29 = sbr.rel (!%p27_p10) target bundleno = 11 (0xb), region = 129 }
 0x240   :  { %703 = vsyncpa [#allocation3], 1 }
 0x241   :  { %705 = vsyncpa [#allocation3 + $0x1], 1 }
 0x242   :  { %706 = vsyncpa [#allocation6], 1 }
 0x243   :  { %708 = vsyncpa [#allocation6 + $0x1], 1 }
 0x244   :  { %709 = vsyncpa [#allocation4], 1 }
 0x245   :  { %711 = vsyncpa [#allocation4 + $0x1], 1 }
 0x246   :  { %712 = vsyncpa [#allocation10], 1 }
 0x247   :  { %714 = vsyncpa [#allocation10 + $0x1], 1 }

</bundles_post_ra>
